<compile_context>
chip_gen: v7x
topology: tpu7x:2x2x1
jax: 0.10.0
libtpu: 0.0.40
codegen_flags: <defaults>
</compile_context>

<pallas_src>
import functools

import jax
import jax.numpy as jnp
from jax.experimental import pallas as pl
from jax.experimental.pallas import tpu as pltpu


# ---------------------------------------------------------------------------
# Kernel
# ---------------------------------------------------------------------------
def _tmc_kernel(x_ref, out_ref, *, num_classes, num_modalities):
    """x_ref: (M, K, TB) evidence tile, batch on lanes.  out_ref: (K, TB)."""
    inv_k = 1.0 / float(num_classes)
    k = float(num_classes)
    # View 0 factor; static leading-axis index -> zero-cost (K, TB) view.
    q = x_ref[0] * inv_k + 1.0
    # Remaining views: DS combination is a pure elementwise product of factors.
    for v in range(1, num_modalities):
        q = q * (x_ref[v] * inv_k + 1.0)
    # Combined Dirichlet alpha = K * q - (K - 1).
    out_ref[...] = q * k + (1.0 - k)


# ---------------------------------------------------------------------------
# Wrappers
# ---------------------------------------------------------------------------
_MAX_TB = 16 * 1024  # lane-tile cap: ~14 MiB double-buffered VMEM (incl. K->16
                     # sublane padding); safe on v5e/v6e (128 MiB) and v7x (64 MiB).


def _round_up(a, m):
    return (a + m - 1) // m * m


def tmc_forward_mkb(x_t, num_classes, *, max_tb=_MAX_TB):
    """Preferred entry point: x_t is (M, K, B) float32 evidence with the batch
    already on the last (lane) axis.  Returns combined alpha in (K, B) layout
    (no input transpose, no output transpose)."""
    M, K, B = x_t.shape
    assert K == num_classes

    if B <= 128:
        # Full-dim lane block (always legal); masked stores are negligible here.
        tb = B
    else:
        # Lane-dense tile (multiple of 128), capped so the footprint stays small
        # and so there are >= 2 grid steps -> "parallel" axis shards across both
        # v7x TensorCores.
        tb = min(max_tb, _round_up(pl.cdiv(B, 2), 128))
    n_blocks = pl.cdiv(B, tb)  # ragged last block handled by Pallas (no jnp.pad)

    kernel = functools.partial(
        _tmc_kernel, num_classes=num_classes, num_modalities=M
    )

    return pl.pallas_call(
        kernel,
        out_shape=jax.ShapeDtypeStruct((K, B), jnp.float32),
        grid=(n_blocks,),
        in_specs=[pl.BlockSpec((M, K, tb), lambda i: (0, 0, i))],
        out_specs=pl.BlockSpec((K, tb), lambda i: (0, i)),
        compiler_params=pltpu.CompilerParams(
            dimension_semantics=("parallel",),     # shards batch tiles on v7x
            allow_input_fusion=[True],             # let XLA fuse the transpose in
            vmem_limit_bytes=32 * 1024 * 1024,     # headroom over v5e's 16 MiB default
        ),
    )(x_t)


def tmc_forward(x, num_classes, *, max_tb=_MAX_TB, return_kb=False):
    """Module-compatible entry point.  x: (B, M, K) float32 evidence.
    Returns combined alpha (B, K) (or (K, B) if return_kb=True, which skips the
    output re-layout entirely for layout-flexible consumers)."""
    B, M, K = x.shape
    # Re-layout so batch is the lane (last) dim.  With allow_input_fusion this
    # transpose can be fused into the pallas operand instead of materializing
    # an extra HBM copy; producers that can emit (M, K, B) natively should call
    # tmc_forward_mkb directly.
    x_t = jnp.transpose(x.astype(jnp.float32), (1, 2, 0))
    out_t = tmc_forward_mkb(x_t, num_classes, max_tb=max_tb)
    if return_kb:
        return out_t
    return jnp.transpose(out_t, (1, 0))


# ---------------------------------------------------------------------------
# Faithful pure-JAX reference (mirrors the PyTorch module op-for-op,
# including the bmm outer product and its trace).
# ---------------------------------------------------------------------------
def _ds_combin_two_ref(alpha1, alpha2, num_classes):
    K = float(num_classes)
    S1 = jnp.sum(alpha1, axis=1, keepdims=True)
    S2 = jnp.sum(alpha2, axis=1, keepdims=True)
    E1 = alpha1 - 1.0
    E2 = alpha2 - 1.0
    b1 = E1 / S1
    b2 = E2 / S2
    u1 = K / S1
    u2 = K / S2
    bb = jnp.einsum("bi,bj->bij", b1, b2)                 # torch.bmm outer product
    bb_sum = jnp.sum(bb, axis=(1, 2))
    bb_diag = jnp.trace(bb, axis1=1, axis2=2)
    C = bb_sum - bb_diag
    denom = (1.0 - C)[:, None]
    b_a = (b1 * b2 + b1 * u2 + b2 * u1) / denom
    u_a = (u1 * u2) / denom
    S_a = K / u_a
    e_a = b_a * S_a
    return e_a + 1.0


def tmc_reference(x, num_classes):
    M = x.shape[1]
    alphas = [x[:, v, :].astype(jnp.float32) + 1.0 for v in range(M)]
    alpha_a = _ds_combin_two_ref(alphas[0], alphas[1], num_classes)
    for v in range(2, M):
        alpha_a = _ds_combin_two_ref(alpha_a, alphas[v], num_classes)
    return alpha_a


# ---------------------------------------------------------------------------
if __name__ == "__main__":
    num_classes = 10
    num_modalities = 6   # forward uses torch.chunk(..., chunks=6, dim=1)

    key = jax.random.PRNGKey(0)
    k0, k1, k2 = jax.random.split(key, 3)

    # Case 1: tiny benchmark shape (single full-dim lane block).
    x_small = jnp.abs(
        jax.random.normal(k0, (8, num_modalities, num_classes), jnp.float32)
    )
    out_small = jax.block_until_ready(tmc_forward(x_small, num_classes))
    ref_small = tmc_reference(x_small, num_classes)
    assert out_small.shape == (8, num_classes)
    assert jnp.allclose(out_small, ref_small, rtol=1e-5, atol=1e-5)

    # Case 2: 2-step grid, 128-aligned ragged last block (384 = 256 + 128 valid).
    x_tiled = jnp.abs(
        jax.random.normal(k1, (384, num_modalities, num_classes), jnp.float32)
    )
    out_tiled = jax.block_until_ready(tmc_forward(x_tiled, num_classes))
    ref_tiled = tmc_reference(x_tiled, num_classes)
    assert jnp.allclose(out_tiled, ref_tiled, rtol=1e-5, atol=1e-5)

    # Case 3: unaligned ragged last block (200 -> tb=128, last block 72 valid lanes).
    x_rag = jnp.abs(
        jax.random.normal(k2, (200, num_modalities, num_classes), jnp.float32)
    )
    out_rag = jax.block_until_ready(tmc_forward(x_rag, num_classes))
    ref_rag = tmc_reference(x_rag, num_classes)
    assert jnp.allclose(out_rag, ref_rag, rtol=1e-5, atol=1e-5)

    # Case 4: (M, K, B)-native producer path — no wrapper transpose, (K, B) output.
    x_t = jnp.transpose(x_tiled, (1, 2, 0))
    out_kb = jax.block_until_ready(tmc_forward_mkb(x_t, num_classes))
    assert jnp.allclose(out_kb.T, ref_tiled, rtol=1e-5, atol=1e-5)

    print("KERNEL_OK")
</pallas_src>

<mosaic_0001>
module attributes {stable_mosaic.version = 11 : i64} {
  func.func @_tmc_kernel(%arg0: i32, %arg1: memref<6x10x8xf32, #tpu.memory_space<vmem>>, %arg2: memref<10x8xf32, #tpu.memory_space<vmem>>) attributes {dimension_semantics = [#tpu.dimension_semantics<parallel>], iteration_bounds = array<i64: 1>, scalar_prefetch = 0 : i64, scratch_operands = 0 : i64, tpu.core_type = #tpu.core_type<tc>, window_params = [{transform_indices = @transform_0, window_bounds = array<i64: 6, 10, 8>}, {transform_indices = @transform_1, window_bounds = array<i64: 10, 8>}]} {
    %c0 = arith.constant 0 : index
    %c0_0 = arith.constant 0 : index
    %c0_1 = arith.constant 0 : index
    %0 = vector.load %arg1[%c0, %c0_0, %c0_1] : memref<6x10x8xf32, #tpu.memory_space<vmem>>, vector<1x10x8xf32>
    %1 = vector.shape_cast %0 : vector<1x10x8xf32> to vector<10x8xf32>
    %cst = arith.constant 1.000000e-01 : f32
    %2 = vector.broadcast %cst : f32 to vector<10x8xf32>
    %3 = arith.mulf %1, %2 : vector<10x8xf32>
    %cst_2 = arith.constant 1.000000e+00 : f32
    %4 = vector.broadcast %cst_2 : f32 to vector<10x8xf32>
    %5 = arith.addf %3, %4 : vector<10x8xf32>
    %c1 = arith.constant 1 : index
    %c0_3 = arith.constant 0 : index
    %c0_4 = arith.constant 0 : index
    %6 = vector.load %arg1[%c1, %c0_3, %c0_4] : memref<6x10x8xf32, #tpu.memory_space<vmem>>, vector<1x10x8xf32>
    %7 = vector.shape_cast %6 : vector<1x10x8xf32> to vector<10x8xf32>
    %cst_5 = arith.constant 1.000000e-01 : f32
    %8 = vector.broadcast %cst_5 : f32 to vector<10x8xf32>
    %9 = arith.mulf %7, %8 : vector<10x8xf32>
    %cst_6 = arith.constant 1.000000e+00 : f32
    %10 = vector.broadcast %cst_6 : f32 to vector<10x8xf32>
    %11 = arith.addf %9, %10 : vector<10x8xf32>
    %12 = arith.mulf %5, %11 : vector<10x8xf32>
    %c2 = arith.constant 2 : index
    %c0_7 = arith.constant 0 : index
    %c0_8 = arith.constant 0 : index
    %13 = vector.load %arg1[%c2, %c0_7, %c0_8] : memref<6x10x8xf32, #tpu.memory_space<vmem>>, vector<1x10x8xf32>
    %14 = vector.shape_cast %13 : vector<1x10x8xf32> to vector<10x8xf32>
    %cst_9 = arith.constant 1.000000e-01 : f32
    %15 = vector.broadcast %cst_9 : f32 to vector<10x8xf32>
    %16 = arith.mulf %14, %15 : vector<10x8xf32>
    %cst_10 = arith.constant 1.000000e+00 : f32
    %17 = vector.broadcast %cst_10 : f32 to vector<10x8xf32>
    %18 = arith.addf %16, %17 : vector<10x8xf32>
    %19 = arith.mulf %12, %18 : vector<10x8xf32>
    %c3 = arith.constant 3 : index
    %c0_11 = arith.constant 0 : index
    %c0_12 = arith.constant 0 : index
    %20 = vector.load %arg1[%c3, %c0_11, %c0_12] : memref<6x10x8xf32, #tpu.memory_space<vmem>>, vector<1x10x8xf32>
    %21 = vector.shape_cast %20 : vector<1x10x8xf32> to vector<10x8xf32>
    %cst_13 = arith.constant 1.000000e-01 : f32
    %22 = vector.broadcast %cst_13 : f32 to vector<10x8xf32>
    %23 = arith.mulf %21, %22 : vector<10x8xf32>
    %cst_14 = arith.constant 1.000000e+00 : f32
    %24 = vector.broadcast %cst_14 : f32 to vector<10x8xf32>
    %25 = arith.addf %23, %24 : vector<10x8xf32>
    %26 = arith.mulf %19, %25 : vector<10x8xf32>
    %c4 = arith.constant 4 : index
    %c0_15 = arith.constant 0 : index
    %c0_16 = arith.constant 0 : index
    %27 = vector.load %arg1[%c4, %c0_15, %c0_16] : memref<6x10x8xf32, #tpu.memory_space<vmem>>, vector<1x10x8xf32>
    %28 = vector.shape_cast %27 : vector<1x10x8xf32> to vector<10x8xf32>
    %cst_17 = arith.constant 1.000000e-01 : f32
    %29 = vector.broadcast %cst_17 : f32 to vector<10x8xf32>
    %30 = arith.mulf %28, %29 : vector<10x8xf32>
    %cst_18 = arith.constant 1.000000e+00 : f32
    %31 = vector.broadcast %cst_18 : f32 to vector<10x8xf32>
    %32 = arith.addf %30, %31 : vector<10x8xf32>
    %33 = arith.mulf %26, %32 : vector<10x8xf32>
    %c5 = arith.constant 5 : index
    %c0_19 = arith.constant 0 : index
    %c0_20 = arith.constant 0 : index
    %34 = vector.load %arg1[%c5, %c0_19, %c0_20] : memref<6x10x8xf32, #tpu.memory_space<vmem>>, vector<1x10x8xf32>
    %35 = vector.shape_cast %34 : vector<1x10x8xf32> to vector<10x8xf32>
    %cst_21 = arith.constant 1.000000e-01 : f32
    %36 = vector.broadcast %cst_21 : f32 to vector<10x8xf32>
    %37 = arith.mulf %35, %36 : vector<10x8xf32>
    %cst_22 = arith.constant 1.000000e+00 : f32
    %38 = vector.broadcast %cst_22 : f32 to vector<10x8xf32>
    %39 = arith.addf %37, %38 : vector<10x8xf32>
    %40 = arith.mulf %33, %39 : vector<10x8xf32>
    %cst_23 = arith.constant 1.000000e+01 : f32
    %41 = vector.broadcast %cst_23 : f32 to vector<10x8xf32>
    %42 = arith.mulf %40, %41 : vector<10x8xf32>
    %cst_24 = arith.constant -9.000000e+00 : f32
    %43 = vector.broadcast %cst_24 : f32 to vector<10x8xf32>
    %44 = arith.addf %42, %43 : vector<10x8xf32>
    %c0_25 = arith.constant 0 : index
    %c0_26 = arith.constant 0 : index
    %45 = vector.load %arg2[%c0_25, %c0_26] : memref<10x8xf32, #tpu.memory_space<vmem>>, vector<10x8xf32>
    tpu.vector_store %arg2[%c0_25, %c0_26], %44 {strides = array<i32>} : memref<10x8xf32, #tpu.memory_space<vmem>>, vector<10x8xf32>,
    return
  }
  func.func @transform_0(%arg0: i32) -> (i32, i32, i32) {
    %c0_i32 = arith.constant 0 : i32
    %c0_i32_0 = arith.constant 0 : i32
    %c0_i32_1 = arith.constant 0 : i32
    return %c0_i32, %c0_i32_0, %arg0 : i32, i32, i32
  }
  func.func @transform_1(%arg0: i32) -> (i32, i32) {
    %c0_i32 = arith.constant 0 : i32
    %c0_i32_0 = arith.constant 0 : i32
    return %c0_i32, %arg0 : i32, i32
  }
}

</mosaic_0001>

<bundles_post_ra>
// kernel: tpu_custom_call.1
= control target key start
LH: loop header
LB: loop body
LE: loop exit
PB: predicated region body
PF: predicated region fallthrough
CT: control target
= control target key end

     0   :  { %vm63_vm0 = vcmask 64512   ;;  %vm65_vm1 = vcmask 58368   ;;  %s133_s0 = inlined_call_operand.vmem [shape: f32[6,10,8], index: 0, kind: input, shape index: {}]   ;;  %s134_s1 = inlined_call_operand.vmem [shape: f32[10,8], index: 1, kind: output, shape index: {}]  }
   0x1   :  { %v8_v0 = vld [vmem:[%s133_s0] sm:$0xff]  ;;  %v71_v1 = vld [vmem:[%s133_s0 + $0x10] sm:$0xff]  ;;  %v9_v15 = vld [vmem:[%s133_s0 + $0x8] sm:$0x3] }
   0x2   :  { %v73_v2 = vld [vmem:[%s133_s0 + $0x20] sm:$0xff]  ;;  %v10_v3 = vmul.f32 0.1, %v8_v0  ;;  %v17_v4 = vmul.f32 0.1, %v71_v1  ;;  %v75_v6 = vld [vmem:[%s133_s0 + $0x30] sm:$0xff] }
   0x3   :  { %v26_v5 = vmul.f32 0.1, %v73_v2  ;;  %v77_v7 = vld [vmem:[%s133_s0 + $0x40] sm:$0xff]  ;;  %v79_v8 = vld [vmem:[%s133_s0 + $0x50] sm:$0xff]  ;;  %v35_v12 = vmul.f32 0.1, %v75_v6 }
   0x4   :  { %v12_v9 = vadd.f32 1.0, %v10_v3  ;;  %v19_v10 = vadd.f32 1.0, %v17_v4  ;;  %v44_v13 = vmul.f32 0.1, %v77_v7  ;;  %v53_v14 = vmul.f32 0.1, %v79_v8 }
   0x5   :  { %v28_v11 = vadd.f32 1.0, %v26_v5  ;;  %v37_v17 = vadd.f32 1.0, %v35_v12  ;;  %v11_v18 = vmul.f32 0.1, %v9_v15  ;;  %v72_v19 = vld [vmem:[%s133_s0 + $0x18] sm:$0x3] }
   0x6   :  { %v21_v16 = vmul.f32 %v19_v10, %v12_v9  ;;  %v18_v20 = vmul.f32 0.1, %v72_v19  ;;  %v74_v21 = vld [vmem:[%s133_s0 + $0x28] sm:$0x3]  ;;  %v46_v23 = vadd.f32 1.0, %v44_v13  ;;  %v55_v31 = vadd.f32 1.0, %v53_v14 }
   0x7   :  { %v13_v24 = vadd.f32 1.0, %v11_v18  ;;  %v27_v25 = vmul.f32 0.1, %v74_v21  ;;  %v76_v26 = vld [vmem:[%s133_s0 + $0x38] sm:$0x3] }
   0x8   :  { %v30_v22 = vmul.f32 %v28_v11, %v21_v16  ;;  %v20_v27 = vadd.f32 1.0, %v18_v20  ;;  %v36_v28 = vmul.f32 0.1, %v76_v26  ;;  %v78_v29 = vld [vmem:[%s133_s0 + $0x48] sm:$0x3] }
   0x9   :  { %v29_v32 = vadd.f32 1.0, %v27_v25  ;;  %v45_v33 = vmul.f32 0.1, %v78_v29  ;;  %v80_v34 = vld [vmem:[%s133_s0 + $0x58] sm:$0x3] }
   0xa   :  { %v39_v30 = vmul.f32 %v37_v17, %v30_v22  ;;  %v22_v35 = vmul.f32 %v20_v27, %v13_v24  ;;  %v38_v36 = vadd.f32 1.0, %v36_v28  ;;  %v54_v37 = vmul.f32 0.1, %v80_v34 }
   0xb   :  { %v47_v40 = vadd.f32 1.0, %v45_v33 }
   0xc   :  { %v48_v38 = vmul.f32 %v46_v23, %v39_v30  ;;  %v31_v39 = vmul.f32 %v29_v32, %v22_v35  ;;  %v56_v43 = vadd.f32 1.0, %v54_v37 }
   0xe   :  { %v57_v41 = vmul.f32 %v55_v31, %v48_v38  ;;  %v40_v42 = vmul.f32 %v38_v36, %v31_v39 }
  0x10   :  { %v59_v44 = vmul.f32 10.0, %v57_v41  ;;  %v49_v45 = vmul.f32 %v47_v40, %v40_v42 }
  0x12   :  { %v61_v46 = vadd.f32 -9.0, %v59_v44  ;;  %v58_v47 = vmul.f32 %v56_v43, %v49_v45 }
  0x14   :  { %64 = vst.msk [vmem:[%s134_s1] sm:$0xff] %vm63_vm0, %v61_v46  ;;  %v60_v48 = vmul.f32 10.0, %v58_v47 }
  0x16   :  { %v62_v49 = vadd.f32 -9.0, %v60_v48 }
  0x18   :  { %66 = vst.msk [vmem:[%s134_s1 + $0x8] sm:$0x3] %vm65_vm1, %v62_v49 }

</bundles_post_ra>
